<compile_context>
chip_gen: v7x
topology: tpu7x:2x2x1
jax: 0.10.0
libtpu: 0.0.40
codegen_flags: <defaults>
</compile_context>

<pallas_src>
import jax
import jax.numpy as jnp
from jax.experimental import pallas as pl
from jax.experimental.pallas import tpu as pltpu


def _make_kernel(batch, tb, nb):
    inv_b = 1.0 / batch  # folded as a compile-time constant (no runtime divide)

    def kernel(xT_ref, label_ref, w1_ref, b1_ref, w2_ref, b2_ref,
               w3_ref, b3_ref, pred_ref, loss_ref):
        i = pl.program_id(0)

        # Layer 1: [H1, D] @ [D, TB] -> [H1, TB]   (bf16 MXU, f32 accumulate)
        h1 = jnp.dot(w1_ref[...], xT_ref[...], preferred_element_type=jnp.float32)
        h1 = jnp.maximum(h1 + b1_ref[...], 0.0)

        # Layer 2: [H2, H1] @ [H1, TB] -> [H2, TB]
        h2 = jnp.dot(w2_ref[...], h1.astype(jnp.bfloat16),
                     preferred_element_type=jnp.float32)
        h2 = jnp.maximum(h2 + b2_ref[...], 0.0)

        # Output head Linear(H2 -> 1): VPU broadcast-multiply + sublane reduce.
        # Avoids a degenerate N=1 MXU matmul and yields a lane-dense [1, TB] row.
        pred = jnp.sum(h2 * w3_ref[...], axis=0, keepdims=True) + b3_ref[...]
        pred_ref[...] = pred.astype(pred_ref.dtype)

        # ---- MSE accumulation (2-D math; padded batch columns masked) -------
        lane = jax.lax.broadcasted_iota(jnp.int32, (1, tb), 1)
        valid = jnp.minimum(batch - i * tb, tb)
        diff = pred - label_ref[...]
        dsq = jnp.where(lane < valid, diff * diff, 0.0)

        @pl.when(i == 0)
        def _init():
            loss_ref[...] = jnp.zeros_like(loss_ref)

        loss_ref[...] += jnp.sum(dsq, keepdims=True)

        @pl.when(i == nb - 1)
        def _finalize():
            loss_ref[...] = loss_ref[...] * inv_b

    return kernel


def text_encoder_head_forward(cls_features, label, params, *, tb=128):
    """pred, loss = fused MLP head + MSE on (synthetic) BERT CLS features.

    cls_features : [B, D] float32  (stands in for last_hidden_state[:, 0])
    label        : [B]    float32
    Returns (pred [B] float32, loss scalar float32).
    """
    B, D = cls_features.shape
    nb = pl.cdiv(B, tb)
    Bp = nb * tb

    # Wrapper-side layout plumbing: features -> sublanes, batch -> lanes,
    # padded to a lane-tile multiple, bf16 for the MXU operands.
    xT = jnp.zeros((D, Bp), jnp.bfloat16)
    xT = xT.at[:, :B].set(cls_features.T.astype(jnp.bfloat16))
    lab = jnp.zeros((1, Bp), jnp.float32)
    lab = lab.at[0, :B].set(label.astype(jnp.float32))

    w1, b1 = params["w1"], params["b1"]
    w2, b2 = params["w2"], params["b2"]
    w3, b3 = params["w3"], params["b3"]
    H1, H2 = w1.shape[0], w2.shape[0]

    resident = lambda i: (0, 0)      # weights: one DMA, VMEM-resident all steps
    col_block = lambda i: (0, i)     # batch-blocked operands

    pred_slab, loss = pl.pallas_call(
        _make_kernel(B, tb, nb),
        grid=(nb,),
        in_specs=[
            pl.BlockSpec((D, tb), col_block),       # xT        [D, Bp] bf16
            pl.BlockSpec((1, tb), col_block),       # label     [1, Bp] f32
            pl.BlockSpec((H1, D), resident),        # w1        bf16
            pl.BlockSpec((H1, 1), resident),        # b1        f32
            pl.BlockSpec((H2, H1), resident),       # w2        bf16
            pl.BlockSpec((H2, 1), resident),        # b2        f32
            pl.BlockSpec((H2, 1), resident),        # w3 column f32
            pl.BlockSpec((1, 1), resident),         # b3        f32
        ],
        out_specs=(
            pl.BlockSpec((1, tb), col_block),       # pred: lane-dense [1, Bp] slab
            pl.BlockSpec((1, 1), resident),         # loss accumulator (resident)
        ),
        out_shape=(
            jax.ShapeDtypeStruct((1, Bp), jnp.float32),
            jax.ShapeDtypeStruct((1, 1), jnp.float32),
        ),
        compiler_params=pltpu.CompilerParams(
            dimension_semantics=("arbitrary",)),    # loss carried across batch axis
    )(xT, lab, w1, b1, w2, b2, w3, b3)

    return pred_slab[0, :B], loss[0, 0]


def init_params(key, encoder_fea_dim):
    """BaseClassifier(D, [D//2, D//8], 1) weights, PyTorch-default uniform init.

    Stored [out_features, in_features] (features on sublanes). The two MXU
    weights are bf16; biases and the 1-wide head column stay f32.
    """
    D = encoder_fea_dim
    h1, h2 = D // 2, D // 8
    k1, k2, k3 = jax.random.split(key, 3)

    def lin(k, fan_in, fan_out):
        bound = 1.0 / jnp.sqrt(jnp.float32(fan_in))
        kw, kb = jax.random.split(k)
        w = jax.random.uniform(kw, (fan_out, fan_in), jnp.float32, -bound, bound)
        b = jax.random.uniform(kb, (fan_out, 1), jnp.float32, -bound, bound)
        return w, b

    w1, b1 = lin(k1, D, h1)
    w2, b2 = lin(k2, h1, h2)
    w3, b3 = lin(k3, h2, 1)
    return {"w1": w1.astype(jnp.bfloat16), "b1": b1,
            "w2": w2.astype(jnp.bfloat16), "b2": b2,
            "w3": w3.T, "b3": b3}           # w3 stored as [H2, 1] column


if __name__ == "__main__":
    B = 160                  # 2 batch blocks of TB=128; last block exercises masking
    D = 256                  # encoder_fea_dim (768 in real BERT; scaled down)

    key = jax.random.PRNGKey(0)
    k_feat, k_label, k_params = jax.random.split(key, 3)

    # Synthetic CLS features standing in for BERT(text).last_hidden_state[:, 0]
    cls_features = jax.random.normal(k_feat, (B, D), dtype=jnp.float32)
    label = jax.random.normal(k_label, (B,), dtype=jnp.float32)
    params = init_params(k_params, D)

    pred, loss = text_encoder_head_forward(cls_features, label, params)
    jax.block_until_ready((pred, loss))

    # Plain-JAX reference mirroring the kernel math (bf16 MXU, f32 accumulate).
    xT = cls_features.T.astype(jnp.bfloat16)
    h1 = jnp.maximum(jnp.dot(params["w1"], xT,
                             preferred_element_type=jnp.float32) + params["b1"], 0.0)
    h2 = jnp.maximum(jnp.dot(params["w2"], h1.astype(jnp.bfloat16),
                             preferred_element_type=jnp.float32) + params["b2"], 0.0)
    pred_ref = jnp.sum(h2 * params["w3"], axis=0) + params["b3"][0, 0]
    loss_ref = jnp.mean((pred_ref - label) ** 2)

    assert jnp.allclose(pred, pred_ref, atol=1e-3, rtol=1e-3)
    assert jnp.allclose(loss, loss_ref, atol=1e-3, rtol=1e-3)

    print("KERNEL_OK")
</pallas_src>

<mosaic_0001>
module attributes {stable_mosaic.version = 11 : i64} {
  func.func @kernel(%arg0: i32, %arg1: memref<256x128xbf16, #tpu.memory_space<vmem>>, %arg2: memref<1x128xf32, #tpu.memory_space<vmem>>, %arg3: memref<128x256xbf16, #tpu.memory_space<vmem>>, %arg4: memref<128x1xf32, #tpu.memory_space<vmem>>, %arg5: memref<32x128xbf16, #tpu.memory_space<vmem>>, %arg6: memref<32x1xf32, #tpu.memory_space<vmem>>, %arg7: memref<32x1xf32, #tpu.memory_space<vmem>>, %arg8: memref<1x1xf32, #tpu.memory_space<vmem>>, %arg9: memref<1x128xf32, #tpu.memory_space<vmem>>, %arg10: memref<1x1xf32, #tpu.memory_space<vmem>>) attributes {dimension_semantics = [#tpu.dimension_semantics<arbitrary>], iteration_bounds = array<i64: 2>, scalar_prefetch = 0 : i64, scratch_operands = 0 : i64, tpu.core_type = #tpu.core_type<tc>, window_params = [{transform_indices = @transform_0, window_bounds = array<i64: 256, 128>}, {transform_indices = @transform_1, window_bounds = array<i64: 1, 128>}, {pipeline_mode = #tpu.pipeline_mode<synchronous>, transform_indices = @transform_2, window_bounds = array<i64: 128, 256>}, {pipeline_mode = #tpu.pipeline_mode<synchronous>, transform_indices = @transform_3, window_bounds = array<i64: 128, 1>}, {pipeline_mode = #tpu.pipeline_mode<synchronous>, transform_indices = @transform_4, window_bounds = array<i64: 32, 128>}, {pipeline_mode = #tpu.pipeline_mode<synchronous>, transform_indices = @transform_5, window_bounds = array<i64: 32, 1>}, {pipeline_mode = #tpu.pipeline_mode<synchronous>, transform_indices = @transform_6, window_bounds = array<i64: 32, 1>}, {pipeline_mode = #tpu.pipeline_mode<synchronous>, transform_indices = @transform_7, window_bounds = array<i64: 1, 1>}, {transform_indices = @transform_8, window_bounds = array<i64: 1, 128>}, {pipeline_mode = #tpu.pipeline_mode<synchronous>, transform_indices = @transform_9, window_bounds = array<i64: 1, 1>}]} {
    %c0 = arith.constant 0 : index
    %c0_0 = arith.constant 0 : index
    %0 = vector.load %arg3[%c0, %c0_0] : memref<128x256xbf16, #tpu.memory_space<vmem>>, vector<128x256xbf16>
    %c0_1 = arith.constant 0 : index
    %c0_2 = arith.constant 0 : index
    %1 = vector.load %arg1[%c0_1, %c0_2] : memref<256x128xbf16, #tpu.memory_space<vmem>>, vector<256x128xbf16>
    %cst = arith.constant dense<0.000000e+00> : vector<128x128xf32>
    %2 = tpu.matmul %0, %1, %cst {dimension_numbers = #tpu.dot_dimension_numbers<[1], [0], [0], [1], [0, 0, 1, 1], [], []>} : vector<128x256xbf16>, vector<256x128xbf16>, vector<128x128xf32> -> vector<128x128xf32>
    %c0_3 = arith.constant 0 : index
    %c0_4 = arith.constant 0 : index
    %3 = vector.load %arg4[%c0_3, %c0_4] : memref<128x1xf32, #tpu.memory_space<vmem>>, vector<128x1xf32>
    %4 = vector.broadcast %3 : vector<128x1xf32> to vector<128x128xf32>
    %5 = arith.addf %2, %4 : vector<128x128xf32>
    %cst_5 = arith.constant 0.000000e+00 : f32
    %6 = vector.broadcast %cst_5 : f32 to vector<128x128xf32>
    %7 = arith.maximumf %5, %6 : vector<128x128xf32>
    %c0_6 = arith.constant 0 : index
    %c0_7 = arith.constant 0 : index
    %8 = vector.load %arg5[%c0_6, %c0_7] : memref<32x128xbf16, #tpu.memory_space<vmem>>, vector<32x128xbf16>
    %9 = arith.truncf %7 : vector<128x128xf32> to vector<128x128xbf16>
    %cst_8 = arith.constant dense<0.000000e+00> : vector<32x128xf32>
    %10 = tpu.matmul %8, %9, %cst_8 {dimension_numbers = #tpu.dot_dimension_numbers<[1], [0], [0], [1], [0, 0, 1, 1], [], []>} : vector<32x128xbf16>, vector<128x128xbf16>, vector<32x128xf32> -> vector<32x128xf32>
    %c0_9 = arith.constant 0 : index
    %c0_10 = arith.constant 0 : index
    %11 = vector.load %arg6[%c0_9, %c0_10] : memref<32x1xf32, #tpu.memory_space<vmem>>, vector<32x1xf32>
    %12 = vector.broadcast %11 : vector<32x1xf32> to vector<32x128xf32>
    %13 = arith.addf %10, %12 : vector<32x128xf32>
    %cst_11 = arith.constant 0.000000e+00 : f32
    %14 = vector.broadcast %cst_11 : f32 to vector<32x128xf32>
    %15 = arith.maximumf %13, %14 : vector<32x128xf32>
    %c0_12 = arith.constant 0 : index
    %c0_13 = arith.constant 0 : index
    %16 = vector.load %arg7[%c0_12, %c0_13] : memref<32x1xf32, #tpu.memory_space<vmem>>, vector<32x1xf32>
    %17 = vector.broadcast %16 : vector<32x1xf32> to vector<32x128xf32>
    %18 = arith.mulf %15, %17 : vector<32x128xf32>
    %cst_14 = arith.constant dense<0.000000e+00> : vector<128xf32>
    %19 = vector.multi_reduction <add>, %18, %cst_14 [0] : vector<32x128xf32> to vector<128xf32>
    %20 = vector.shape_cast %19 : vector<128xf32> to vector<1x128xf32>
    %c0_15 = arith.constant 0 : index
    %c0_16 = arith.constant 0 : index
    %21 = vector.load %arg8[%c0_15, %c0_16] : memref<1x1xf32, #tpu.memory_space<vmem>>, vector<1x1xf32>
    %22 = vector.broadcast %21 : vector<1x1xf32> to vector<1x128xf32>
    %23 = arith.addf %20, %22 : vector<1x128xf32>
    %c0_17 = arith.constant 0 : index
    %c0_18 = arith.constant 0 : index
    %24 = vector.load %arg9[%c0_17, %c0_18] : memref<1x128xf32, #tpu.memory_space<vmem>>, vector<1x128xf32>
    tpu.vector_store %arg9[%c0_17, %c0_18], %23 {strides = array<i32>} : memref<1x128xf32, #tpu.memory_space<vmem>>, vector<1x128xf32>,
    %25 = tpu.iota {dimensions = array<i32: 1>} : vector<1x128xi32>
    %c128_i32 = arith.constant 128 : i32
    %26 = arith.muli %arg0, %c128_i32 : i32
    %c160_i32 = arith.constant 160 : i32
    %27 = arith.subi %c160_i32, %26 : i32
    %c128_i32_19 = arith.constant 128 : i32
    %28 = arith.minsi %27, %c128_i32_19 : i32
    %c0_20 = arith.constant 0 : index
    %c0_21 = arith.constant 0 : index
    %29 = vector.load %arg2[%c0_20, %c0_21] : memref<1x128xf32, #tpu.memory_space<vmem>>, vector<1x128xf32>
    %30 = arith.subf %23, %29 : vector<1x128xf32>
    %31 = vector.broadcast %28 : i32 to vector<1x128xi32>
    %32 = arith.cmpi slt, %25, %31 : vector<1x128xi32>
    %33 = arith.mulf %30, %30 : vector<1x128xf32>
    %cst_22 = arith.constant 0.000000e+00 : f32
    %34 = vector.broadcast %cst_22 : f32 to vector<1x128xf32>
    %35 = arith.select %32, %33, %34 : vector<1x128xi1>, vector<1x128xf32>
    %c0_i32 = arith.constant 0 : i32
    %36 = arith.cmpi eq, %arg0, %c0_i32 : i32
    %37 = arith.extui %36 : i1 to i32
    %c0_i32_23 = arith.constant 0 : i32
    %38 = arith.cmpi ne, %37, %c0_i32_23 : i32
    scf.if %38 {
      %cst_30 = arith.constant 0.000000e+00 : f32
      %50 = vector.broadcast %cst_30 : f32 to vector<1x1xf32>
      %c0_31 = arith.constant 0 : index
      %c0_32 = arith.constant 0 : index
      %51 = vector.load %arg10[%c0_31, %c0_32] : memref<1x1xf32, #tpu.memory_space<vmem>>, vector<1x1xf32>
      tpu.vector_store %arg10[%c0_31, %c0_32], %50 {strides = array<i32>} : memref<1x1xf32, #tpu.memory_space<vmem>>, vector<1x1xf32>,
    } else {
    }
    %c0_24 = arith.constant 0 : index
    %c0_25 = arith.constant 0 : index
    %39 = vector.load %arg10[%c0_24, %c0_25] : memref<1x1xf32, #tpu.memory_space<vmem>>, vector<1x1xf32>
    %40 = vector.shape_cast %35 : vector<1x128xf32> to vector<1x1x128xf32>
    %cst_26 = arith.constant dense<0.000000e+00> : vector<1xf32>
    %41 = vector.multi_reduction <add>, %40, %cst_26 [1, 2] : vector<1x1x128xf32> to vector<1xf32>
    %42 = vector.shape_cast %41 : vector<1xf32> to vector<1x1x1xf32>
    %43 = vector.extract %42[0, 0, 0] : f32 from vector<1x1x1xf32>
    %44 = vector.broadcast %43 : f32 to vector<1x1xf32>
    %45 = arith.addf %39, %44 : vector<1x1xf32>
    %c0_27 = arith.constant 0 : index
    %c0_28 = arith.constant 0 : index
    %46 = vector.load %arg10[%c0_27, %c0_28] : memref<1x1xf32, #tpu.memory_space<vmem>>, vector<1x1xf32>
    tpu.vector_store %arg10[%c0_27, %c0_28], %45 {strides = array<i32>} : memref<1x1xf32, #tpu.memory_space<vmem>>, vector<1x1xf32>,
    %c1_i32 = arith.constant 1 : i32
    %47 = arith.cmpi eq, %arg0, %c1_i32 : i32
    %48 = arith.extui %47 : i1 to i32
    %c0_i32_29 = arith.constant 0 : i32
    %49 = arith.cmpi ne, %48, %c0_i32_29 : i32
    scf.if %49 {
      %c0_30 = arith.constant 0 : index
      %c0_31 = arith.constant 0 : index
      %50 = vector.load %arg10[%c0_30, %c0_31] : memref<1x1xf32, #tpu.memory_space<vmem>>, vector<1x1xf32>
      %cst_32 = arith.constant 6.250000e-03 : f32
      %51 = vector.broadcast %cst_32 : f32 to vector<1x1xf32>
      %52 = arith.mulf %50, %51 : vector<1x1xf32>
      %c0_33 = arith.constant 0 : index
      %c0_34 = arith.constant 0 : index
      %53 = vector.load %arg10[%c0_33, %c0_34] : memref<1x1xf32, #tpu.memory_space<vmem>>, vector<1x1xf32>
      tpu.vector_store %arg10[%c0_33, %c0_34], %52 {strides = array<i32>} : memref<1x1xf32, #tpu.memory_space<vmem>>, vector<1x1xf32>,
    } else {
    }
    return
  }
  func.func @transform_0(%arg0: i32) -> (i32, i32) {
    %c0_i32 = arith.constant 0 : i32
    %c0_i32_0 = arith.constant 0 : i32
    return %c0_i32, %arg0 : i32, i32
  }
  func.func @transform_1(%arg0: i32) -> (i32, i32) {
    %c0_i32 = arith.constant 0 : i32
    %c0_i32_0 = arith.constant 0 : i32
    return %c0_i32, %arg0 : i32, i32
  }
  func.func @transform_2(%arg0: i32) -> (i32, i32) {
    %c0_i32 = arith.constant 0 : i32
    %c0_i32_0 = arith.constant 0 : i32
    %c0_i32_1 = arith.constant 0 : i32
    return %c0_i32, %c0_i32_0 : i32, i32
  }
  func.func @transform_3(%arg0: i32) -> (i32, i32) {
    %c0_i32 = arith.constant 0 : i32
    %c0_i32_0 = arith.constant 0 : i32
    %c0_i32_1 = arith.constant 0 : i32
    return %c0_i32, %c0_i32_0 : i32, i32
  }
  func.func @transform_4(%arg0: i32) -> (i32, i32) {
    %c0_i32 = arith.constant 0 : i32
    %c0_i32_0 = arith.constant 0 : i32
    %c0_i32_1 = arith.constant 0 : i32
    return %c0_i32, %c0_i32_0 : i32, i32
  }
  func.func @transform_5(%arg0: i32) -> (i32, i32) {
    %c0_i32 = arith.constant 0 : i32
    %c0_i32_0 = arith.constant 0 : i32
    %c0_i32_1 = arith.constant 0 : i32
    return %c0_i32, %c0_i32_0 : i32, i32
  }
  func.func @transform_6(%arg0: i32) -> (i32, i32) {
    %c0_i32 = arith.constant 0 : i32
    %c0_i32_0 = arith.constant 0 : i32
    %c0_i32_1 = arith.constant 0 : i32
    return %c0_i32, %c0_i32_0 : i32, i32
  }
  func.func @transform_7(%arg0: i32) -> (i32, i32) {
    %c0_i32 = arith.constant 0 : i32
    %c0_i32_0 = arith.constant 0 : i32
    %c0_i32_1 = arith.constant 0 : i32
    return %c0_i32, %c0_i32_0 : i32, i32
  }
  func.func @transform_8(%arg0: i32) -> (i32, i32) {
    %c0_i32 = arith.constant 0 : i32
    %c0_i32_0 = arith.constant 0 : i32
    return %c0_i32, %arg0 : i32, i32
  }
  func.func @transform_9(%arg0: i32) -> (i32, i32) {
    %c0_i32 = arith.constant 0 : i32
    %c0_i32_0 = arith.constant 0 : i32
    %c0_i32_1 = arith.constant 0 : i32
    return %c0_i32, %c0_i32_0 : i32, i32
  }
}

</mosaic_0001>

<bundles_post_ra>
// kernel: tpu_custom_call.1
= control target key start
LH: loop header
LB: loop body
LE: loop exit
PB: predicated region body
PF: predicated region fallthrough
CT: control target
= control target key end

     0   :  { %s1872_s0 = inlined_call_operand.hbm [shape: bf16[256,256], index: 0, kind: input, shape index: {}]   ;;  %s1873_s1 = inlined_call_operand.vmem [shape: f32[1,256], index: 1, kind: input, shape index: {}]   ;;  %s1874_s2 = inlined_call_operand.vmem [shape: bf16[128,256], index: 2, kind: input, shape index: {}]   ;;  %s1875_s3 = inlined_call_operand.vmem [shape: f32[128,1], index: 3, kind: input, shape index: {}]   ;;  %s1876_s4 = inlined_call_operand.vmem [shape: bf16[32,128], index: 4, kind: input, shape index: {}]   ;;  %s1877_s5 = inlined_call_operand.vmem [shape: f32[32,1], index: 5, kind: input, shape index: {}]   ;;  %s1878_s6 = inlined_call_operand.vmem [shape: f32[32,1], index: 6, kind: input, shape index: {}]   ;;  %s1879_s7 = inlined_call_operand.<no memory space> [shape: f32[1,1], index: 7, kind: input, shape index: {}]   ;;  %s1880_s8 = inlined_call_operand.hbm [shape: f32[1,256], index: 8, kind: output, shape index: {0}]   ;;  %s1881_s9 = inlined_call_operand.hbm [shape: f32[1,1], index: 9, kind: output, shape index: {1}]  }
   0x1   :  { %v15_v0 = vstv %s1879_s7 }
   0x2   :  { %16 = vst [vmem:[#allocation2] sm:$0x1] %v15_v0 }
   0x3   :  { %17 = vsyncpa [#allocation4], 0 }
   0x4   :  { %19 = vsyncpa [#allocation4 + $0x1], 0 }
   0x5   :  { %20 = vsyncpa [#allocation5], 0 }
   0x6   :  { %22 = vsyncpa [#allocation5 + $0x1], 0 }
   0x7   :  { %23 = vsyncpa [#allocation8], 0  ;;  %s1535_s11 = smov 0   ;;  %s1537_s12 = smov 0  }
   0x8   :  { %s1539_s13 = smov 0   ;;  %s1541_s14 = smov 0  }
   0x9 LB: > { %s1556_s7 = sadd.s32 4294967295, %s1472_s14   ;;  %s1099_s15 = sadd.s32 4294967294, %s1472_s14   ;;  %s1472_s14 = sphi %s1541_s14, %s1901_s14   ;;  %s1468_s13 = sphi %s1539_s13, %s1900_s13   ;;  %s1464_s12 = sphi %s1537_s12, %s1899_s12   ;;  %s1460_s11 = sphi %s1535_s11, %s1898_s11  }
   0xa   : > { %s1560_s16 = sadd.s32 1, %s1472_s14   ;;  %s36_s17 = sadd.s32 1, %s1468_s13 }
   0xb   : > { %s33_s18 = ssub.s32 %s1472_s14, %s1560_s16  ;;  %p43_p0 = scmp.ne.s32.totalorder %s1468_s13, %s1464_s12 }
   0xc   : > { %p34_p1 = scmp.eq.s32.totalorder %s33_s18, 0  ;;  %p44_p2 = scmp.eq.s32.totalorder %s1472_s14, 0 }
   0xd   : > { %p49_p3 = scmp.ne.s32.totalorder %s1464_s12, %s1460_s11  ;;  %p50_p4 = scmp.eq.s32.totalorder %s1556_s7, 0 }
   0xe   : > { %s1572_s19 = scalar_select %p34_p1, %s1468_s13, %s36_s17  }
   0xf   : > { %p1574_p5 = por %p44_p2, %p43_p0  ;;  %p1578_p6 = por %p50_p4, %p49_p3 }
  0x10   : > { %p1882_p7 = scmp.eq.s32.totalorder %s1556_s7, 1  ;;  %p231_p8 = scmp.eq.s32.totalorder %s1099_s15, 1 }
  0x11   : > { %p1260_p10 = scmp.lt.s32.totalorder %s1472_s14, 2  ;;  %s290_s24 = sand.u32 1, %s1468_s13  }
  0x12   : > { %p1587_p11 = por %p1882_p7, %p43_p0  ;;  %p1591_p12 = por %p231_p8, %p49_p3 }
  0x13   : > { %s1103_s25 = sshll.u32 %s1472_s14, 6  ;;  %s1102_s26 = sshll.u32 %s290_s24, 7 }
  0x14   : > { %s1886_s22 = scalar_select %p1587_p11, 1, 0 }
  0x15   : > { %s1887_s23 = scalar_select %p1591_p12, 1, 0 }
  0x16   : > { %s1600_s29 = scalar_lea.hbm %s1872_s0, %s1103_s25  ;;  %s294_s30 = scalar_lea.vmem [#allocation3], %s1102_s26 }
  0x17   : > { %s300_s10 = sshll.u32 %s294_s30, 4  ;;  %p1604_p13 = pnand %p1260_p10, %p1574_p5  ;;  %s1608_s10 = int_to_ptr.vmem [resolvable:$true] %s300_s10 }
  0x18   : > { %s1611_s17 = scalar_lea.sflag [#allocation4], %s290_s24  ;;  %s1346_s18 = scalar_lea.hbm %s1600_s29, 2048 }
  0x19   : > { %p1347_p1 = scmp.ne.s32.totalorder %s1600_s29, %s1346_s18  ;;  %p1348_p2 = pneg %p1604_p13 }
  0x1a   : > { %s1351_s26 = scalar_lea.hbm %s1872_s0, 4096  ;;  %p1352_p5 = scmp.lt.u32.totalorder %s1600_s29, %s1872_s0 }
  0x1b   : > { %p1349_p3 = pnand %p1348_p2, %p1347_p1  ;;  %p1353_p8 = scmp.lt.u32.totalorder %s1351_s26, %s1346_s18 }
  0x1c   : > { %p1355_p9 = scmp.lt.u32.totalorder %s1346_s18, %s1600_s29 }
  0x1d   : > { %p1350_p4 = pneg %p1349_p3  ;;  %p1354_p10 = por %p1353_p8, %p1352_p5 }
  0x1f   : > { %p1356_p7 = por %p1355_p9, %p1354_p10 }
  0x21   : > { %p1357_p0 = pnand %p1356_p7, %p1350_p4 }
  0x23   : > { %1360 = shalt.err (!%p1357_p0)
}
  0x24   : > { %s1361_s24 = scalar_lea.vmem %s1608_s10, 2048  ;;  %s1474_s30 = smov [#allocation3]  }
  0x25   : > { %p1362_p1 = scmp.ne.s32.totalorder %s1608_s10, %s1361_s24  ;;  %s1366_s20 = sshll.u32 %s1474_s30, 4  ;;  %s1367_s20 = int_to_ptr.vmem [resolvable:$false] %s1366_s20 }
  0x26   : > { %s1368_s25 = scalar_lea.vmem %s1367_s20, 4096  ;;  %p1369_p11 = scmp.lt.s32.totalorder %s1608_s10, %s1367_s20 }
  0x27   : > { %p1364_p3 = pnand %p1362_p1, %p1348_p2  ;;  %p1370_p5 = scmp.lt.s32.totalorder %s1368_s25, %s1361_s24 }
  0x29   : > { %p1365_p12 = pneg %p1364_p3  ;;  %p1371_p8 = por %p1370_p5, %p1369_p11 }
  0x2b   : > { %p1372_p9 = pnand %p1371_p8, %p1365_p12 }
  0x2d   : > { %1375 = shalt.err (!%p1372_p9)
}
  0x2e   : > { %s1475_s18 = smov 128   ;;  %s1476_s26 = smov 64  }
  0x2f   : > { %s1477_s27 = smov 4   ;;  %p314_p7 = scmp.lt.s32.totalorder %s1472_s14, 3 }
  0x30   : > { %1255 = dma.hbm_to_vmem [thread:$0]  (!%p1604_p13), %s1600_s29, 2048, %s1608_s10, %s1611_s17, %s1475_s18, %s1476_s26, %s1477_s27  }
  0x31   : > { %p1889_p0 = scmp.ge.s32.totalorder %s1472_s14, 1 }
  0x33   : > { %p315_p2 = pnand %p1889_p0, %p314_p7 }
  0x34   : > { %s1643_s28 = sand.u32 (!%p315_p2), 1, %s1464_s12  }
  0x35   : > { %318 = sbr.rel (%p315_p2) target bundleno = 898 (0x382), region = 52  ;;  %s1105_s24 = sshll.u32 (!%p315_p2), %s1643_s28, 7 }
  0x36   : > { %s321_s30 = scalar_lea.sflag (!%p315_p2), [#allocation4], %s1643_s28  ;;  %s1647_s20 = scalar_lea.vmem (!%p315_p2), [#allocation3], %s1105_s24 }
  0x3c   : > { %1447 = dma.done.wait (%p1578_p6), %s321_s30, 2048  }
  0x3d   : > { %1449 = vsyncadd (%p1578_p6), %s321_s30, 4294965248  ;;  %v1478_v1 = vmov 0   ;;  %v1304_v2 = vld [vmem:[%s1647_s20 + $0x40] sm:$0xff]   ;;  %v1306_v4 = vld [vmem:[%s1647_s20 + $0x48] sm:$0xff]   ;;  %p361_p6 = scmp.lt.s32.totalorder %s1556_s7, 1  ;;  %s358_s18 = scalar_lea.vmem [#allocation6], %s1643_s28 }
  0x3e   : > { %1302 = vset.pattern.permute.xlu0 %v1478_v1  ;;  %1303 = vset.pattern.permute.xlu1 %v1478_v1  ;;  %v1305_v3 = vld [vmem:[%s1647_s20] sm:$0xff]   ;;  %v1307_v5 = vld [vmem:[%s1647_s20 + $0x8] sm:$0xff]   ;;  %v1308_v6 = vld [vmem:[%s1647_s20 + $0x50] sm:$0xff]   ;;  %p1141_p12 = scmp.ne.s32.totalorder %s1556_s7, 0 }
  0x3f   : > { %1148 = vmatprep.subr.bf16.mxu0 %v1304_v2  ;;  %v1309_v7 = vld [vmem:[%s1647_s20 + $0x10] sm:$0xff]   ;;  %v1310_v8 = vld [vmem:[%s1647_s20 + $0x58] sm:$0xff]   ;;  %v1312_v10 = vld [vmem:[%s1647_s20 + $0x60] sm:$0xff]   ;;  %s362_s10 = scalar_select %p361_p6, %s1556_s7, 1 }
  0x40   : > { %1149 = vmatpush3.bf16.msra.mxu0 %v1305_v3  ;;  %v1311_v9 = vld [vmem:[%s1647_s20 + $0x18] sm:$0xff]   ;;  %v1313_v11 = vld [vmem:[%s1647_s20 + $0x20] sm:$0xff]   ;;  %v1314_v12 = vld [vmem:[%s1647_s20 + $0x68] sm:$0xff]   ;;  %vm964_vm1 = vcmask (!%p1141_p12), 0  }
  0x41   : > { %1150 = vmatprep.subr.bf16.mxu0 %v1306_v4  ;;  %v1322_v13 = vld [vmem:[%s1874_s2 + $0x4] ss:$8 sps:$4 sm:$0xff]   ;;  %v1316_v15 = vld [vmem:[%s1647_s20 + $0x70] sm:$0xff]   ;;  %v1318_v17 = vld [vmem:[%s1647_s20 + $0x78] sm:$0xff]   ;;  %s363_s25 = scalar_lea.vmem %s1873_s1, %s362_s10 }
  0x42   : > { %v1315_v14 = vld [vmem:[%s1647_s20 + $0x28] sm:$0xff]   ;;  %717 = vmatprep.mubr.bf16.mxu0 %v1322_v13  ;;  %v1317_v16 = vld [vmem:[%s1647_s20 + $0x30] sm:$0xff]   ;;  %v413_v18 = vld [vmem:[%s1875_s3] sm:$0xff] }
  0x43   : > { %v1319_v19 = vld [vmem:[%s1647_s20 + $0x38] sm:$0xff]   ;;  %431 = vperm.xlu0 %1302, %v413_v18   ;;  %v415_v20 = vld [vmem:[%s1875_s3 + $0x10] sm:$0xff]  ;;  %v414_v21 = vld [vmem:[%s1875_s3 + $0x8] sm:$0xff]  ;;  %s1140_s20 = sshll.u32 %s1556_s7, 7 }
  0x44   : > { %1151 = vmatpush3.bf16.msra.mxu0 %v1307_v5  ;;  %441 = vperm.xlu1 %1303, %v415_v20   ;;  %v416_v22 = vld [vmem:[%s1875_s3 + $0x18] sm:$0xff]  ;;  %v1320_v23 = vld [vmem:[%s1874_s2] ss:$8 sps:$4 sm:$0xff]   ;;  %v419_v27 = vld [vmem:[%s1875_s3 + $0x30] sm:$0xff]  ;;  %s951_s29 = ssub.s32 160, %s1140_s20 }
  0x45   : > { %1152 = vmatprep.subr.bf16.mxu0 %v1308_v6  ;;  %v1323_v24 = vld [vmem:[%s1874_s2 + $0x14] ss:$8 sps:$4 sm:$0xff]   ;;  %v417_v25 = vld [vmem:[%s1875_s3 + $0x20] sm:$0xff]  ;;  %v418_v26 = vld [vmem:[%s1875_s3 + $0x28] sm:$0xff]  ;;  %p952_p11 = scmp.lt.s32.totalorder %s951_s29, 128 }
  0x46   : > { %v420_v28 = vld [vmem:[%s1875_s3 + $0x38] sm:$0xff]  ;;  %v1326_v30 = vld [vmem:[%s1874_s2 + $0x24] ss:$8 sps:$4 sm:$0xff]   ;;  %v423_v33 = vld [vmem:[%s1875_s3 + $0x50] sm:$0xff] }
  0x47   : > { %436 = vperm.xlu0 %1302, %v414_v21   ;;  %v1325_v29 = vld [vmem:[%s1874_s2 + $0x10] ss:$8 sps:$4 sm:$0xff]   ;;  %v421_v31 = vld [vmem:[%s1875_s3 + $0x40] sm:$0xff]  ;;  %v422_v32 = vld [vmem:[%s1875_s3 + $0x48] sm:$0xff]  ;;  %s1903_s29 = smov (!%p952_p11, %s951_s29), 128 }
  0x48   : > { %1153 = vmatpush3.bf16.msra.mxu0 %v1309_v7  ;;  %446 = vperm.xlu1 %1303, %v416_v22   ;;  %v424_v34 = vld [vmem:[%s1875_s3 + $0x58] sm:$0xff]  ;;  %v1328_v35 = vld [vmem:[%s1874_s2 + $0x20] ss:$8 sps:$4 sm:$0xff]   ;;  %v427_v39 = vld [vmem:[%s1875_s3 + $0x70] sm:$0xff] }
  0x49   : > { %1154 = vmatprep.subr.bf16.mxu0 %v1310_v8  ;;  %v1329_v36 = vld [vmem:[%s1874_s2 + $0x34] ss:$8 sps:$4 sm:$0xff]   ;;  %v425_v37 = vld [vmem:[%s1875_s3 + $0x60] sm:$0xff]  ;;  %v426_v38 = vld [vmem:[%s1875_s3 + $0x68] sm:$0xff] }
  0x4a   : > { %v428_v40 = vld [vmem:[%s1875_s3 + $0x78] sm:$0xff]  ;;  %v1332_v42 = vld [vmem:[%s1874_s2 + $0x44] ss:$8 sps:$4 sm:$0xff]   ;;  %v812_v45 = vld [vmem:[%s1877_s5 + $0x10] sm:$0xff] }
  0x4b   : > { %451 = vperm.xlu0 %1302, %v417_v25   ;;  %v1331_v41 = vld [vmem:[%s1874_s2 + $0x30] ss:$8 sps:$4 sm:$0xff]   ;;  %v810_v43 = vld [vmem:[%s1877_s5] sm:$0xff]  ;;  %v811_v44 = vld [vmem:[%s1877_s5 + $0x8] sm:$0xff] }
  0x4c   : > { %1155 = vmatpush3.bf16.msra.mxu0 %v1311_v9  ;;  %456 = vperm.xlu1 %1303, %v418_v26   ;;  %v813_v46 = vld [vmem:[%s1877_s5 + $0x18] sm:$0xff]  ;;  %v1334_v47 = vld [vmem:[%s1874_s2 + $0x40] ss:$8 sps:$4 sm:$0xff]   ;;  %v901_v51 = vld [vmem:[%s1878_s6 + $0x10] sm:$0xff] }
  0x4d   : > { %1156 = vmatprep.subr.bf16.mxu0 %v1312_v10  ;;  %v1335_v48 = vld [vmem:[%s1874_s2 + $0x54] ss:$8 sps:$4 sm:$0xff]   ;;  %v899_v49 = vld [vmem:[%s1878_s6] sm:$0xff]  ;;  %v900_v50 = vld [vmem:[%s1878_s6 + $0x8] sm:$0xff] }
  0x4e   : > { %v902_v52 = vld [vmem:[%s1878_s6 + $0x18] sm:$0xff]  ;;  %v1338_v54 = vld [vmem:[%s1874_s2 + $0x64] ss:$8 sps:$4 sm:$0xff]   ;;  %v936_v55 = vld [vmem:[#allocation2] sm:$0x1] }
  0x4f   : > { %461 = vperm.xlu0 %1302, %v419_v27   ;;  %v1337_v53 = vld [vmem:[%s1874_s2 + $0x50] ss:$8 sps:$4 sm:$0xff]   ;;  %v1340_v56 = vld [vmem:[%s1874_s2 + $0x60] ss:$8 sps:$4 sm:$0xff]   ;;  %v1341_v57 = vld [vmem:[%s1874_s2 + $0x74] ss:$8 sps:$4 sm:$0xff]  }
  0x50   : > { %1157 = vmatpush3.bf16.msra.mxu0 %v1313_v11  ;;  %466 = vperm.xlu1 %1303, %v420_v28   ;;  %v1343_v58 = vld [vmem:[%s1874_s2 + $0x70] ss:$8 sps:$4 sm:$0xff]   ;;  %v1344_v59 = vld [vmem:[%s1876_s4] sm:$0xff]  }
  0x51   : > { %1158 = vmatprep.subr.bf16.mxu0 %v1314_v12  ;;  %1238 = vmatprep.mubr.bf16.mxu1 %v1344_v59 }
  0x53   : > { %471 = vperm.xlu0 %1302, %v421_v31  }
  0x54   : > { %1159 = vmatpush3.bf16.msra.mxu0 %v1315_v14  ;;  %476 = vperm.xlu1 %1303, %v422_v32  }
  0x55   : > { %1160 = vmatprep.subr.bf16.mxu0 %v1316_v15 }
  0x57   : > { %481 = vperm.xlu0 %1302, %v423_v33  }
  0x58   : > { %1161 = vmatpush3.bf16.msra.mxu0 %v1317_v16  ;;  %486 = vperm.xlu1 %1303, %v424_v34  }
  0x59   : > { %1162 = vmatprep.subr.bf16.mxu0 %v1318_v17 }
  0x5b   : > { %491 = vperm.xlu0 %1302, %v425_v37  }
  0x5c   : > { %1163 = vmatpush3.bf16.msra.mxu0 %v1319_v19  ;;  %496 = vperm.xlu1 %1303, %v426_v38  }
  0x5f   : > { %718 = vmatmul.mubr.bf16.vlgmr.msra.gmra.mrb[0].mxu0 %v1320_v23  ;;  %501 = vperm.xlu0 %1302, %v427_v39  }
  0x60   : > { %725 = vmatprep.mubr.bf16.mxu0 %v1323_v24  ;;  %506 = vperm.xlu1 %1303, %v428_v40  }
  0x63   : > { %816 = vperm.xlu0 %1302, %v810_v43  }
  0x64   : > { %821 = vperm.xlu1 %1303, %v811_v44  }
  0x67   : > { %726 = vmatmul.mubr.bf16.gmra.mrb[4].mxu0 %v1325_v29  ;;  %826 = vperm.xlu0 %1302, %v812_v45  }
  0x68   : > { %733 = vmatprep.mubr.bf16.mxu0 %v1326_v30  ;;  %831 = vperm.xlu1 %1303, %v813_v46  }
  0x6b   : > { %905 = vperm.xlu0 %1302, %v899_v49  }
  0x6c   : > { %910 = vperm.xlu1 %1303, %v900_v50  }
  0x6f   : > { %734 = vmatmul.mubr.bf16.gmra.mrb[8].mxu0 %v1328_v35  ;;  %915 = vperm.xlu0 %1302, %v901_v51  }
  0x70   : > { %741 = vmatprep.mubr.bf16.mxu0 %v1329_v36  ;;  %920 = vperm.xlu1 %1303, %v902_v52  }
  0x73   : > { %939 = vperm.xlu0 %1302, %v936_v55  }
  0x77   : > { %742 = vmatmul.mubr.bf16.gmra.mrb[12].mxu0 %v1331_v41 }
  0x78   : > { %749 = vmatprep.mubr.bf16.mxu0 %v1332_v42 }
  0x7f   : > { %750 = vmatmul.mubr.bf16.gmra.mrb[16].mxu0 %v1334_v47 }
  0x80   : > { %757 = vmatprep.mubr.bf16.mxu0 %v1335_v48 }
  0x87   : > { %758 = vmatmul.mubr.bf16.gmra.mrb[20].mxu0 %v1337_v53 }
  0x88   : > { %765 = vmatprep.mubr.bf16.mxu0 %v1338_v54 }
  0x8f   : > { %766 = vmatmul.mubr.bf16.gmra.mrb[24].mxu0 %v1340_v56 }
  0x90   : > { %773 = vmatprep.mubr.bf16.mxu0 %v1341_v57 }
  0x97   : > { %774 = vmatmul.mubr.bf16.gmra.mrb[28].mxu0 %v1343_v58 }
  0xc2   : > { %v432_v60 = vpop.permute.xlu0 %431 }
  0xc3   : > { %v442_v6 = vpop.permute.xlu1 %441 }
  0xc6   : > { %v437_v4 = vpop.permute.xlu0 %436 }
  0xc7   : > { %v447_v17 = vpop.permute.xlu1 %446 }
  0xca   : > { %v452_v26 = vpop.permute.xlu0 %451 }
  0xcb   : > { %v457_v30 = vpop.permute.xlu1 %456 }
  0xce   : > { %v462_v39 = vpop.permute.xlu0 %461 }
  0xcf   : > { %v467_v43 = vpop.permute.xlu1 %466 }
  0xd2   : > { %v472_v52 = vpop.permute.xlu0 %471 }
  0xd3   : > { %v477_v56 = vpop.permute.xlu1 %476 }
 0x132   : > { %v1164_v61 = vpop.f32.mrb[0].mxu0 }
 0x133   : > { %v1165_v62 = vpop.f32.mrb[1].mxu0 }
 0x134   : > { %v1166_v63 = vadd.f32 %v1165_v62, %v1164_v61  ;;  %v1167_v0 = vpop.f32.mrb[2].mxu0 }
 0x135   : > { %v1168_v1 = vpop.f32.mrb[3].mxu0 }
 0x136   : > { %v720_v2 = vadd.f32 %v1166_v63, %v432_v60  ;;  %v1169_v3 = vadd.f32 %v1168_v1, %v1167_v0  ;;  %v482_v1 = vpop.permute.xlu0 %481 }
 0x138   : > { %v723_v5 = vadd.f32 %v1169_v3, %v437_v4  ;;  %v782_v7 = vmax.f32 %v720_v2, 0.0 }
 0x13a   : > { %v783_v8 = vmax.f32 %v723_v5, 0.0  ;;  %v1170_v9 = vpop.f32.mrb[4].mxu0  ;;  %v487_v5 = vpop.permute.xlu1 %486 }
 0x13b   : > { %v1171_v10 = vpop.f32.mrb[5].mxu0 }
 0x13c   : > { %v1172_v11 = vadd.f32 %v1171_v10, %v1170_v9  ;;  %v1173_v12 = vpop.f32.mrb[6].mxu0  ;;  %v802_v13 = vpack.c.bf16 %v783_v8, %v782_v7 }
 0x13d   : > { %v1174_v14 = vpop.f32.mrb[7].mxu0 }
 0x13e   : > { %v728_v15 = vadd.f32 %v1172_v11, %v442_v6  ;;  %v1175_v16 = vadd.f32 %v1174_v14, %v1173_v12  ;;  %1222 = vmatprep.subr.bf16.mxu1 %v802_v13  ;;  %v492_v14 = vpop.permute.xlu0 %491 }
 0x13f   : > { %1223 = vmatpush3.bf16.msra.mxu1 %v802_v13 }
 0x140   : > { %v731_v18 = vadd.f32 %v1175_v16, %v447_v17  ;;  %v784_v19 = vmax.f32 %v728_v15, 0.0 }
 0x142   : > { %v785_v20 = vmax.f32 %v731_v18, 0.0  ;;  %v1176_v21 = vpop.f32.mrb[8].mxu0  ;;  %v497_v18 = vpop.permute.xlu1 %496 }
 0x143   : > { %v1177_v22 = vpop.f32.mrb[9].mxu0 }
 0x144   : > { %v1178_v23 = vadd.f32 %v1177_v22, %v1176_v21  ;;  %v1179_v24 = vpop.f32.mrb[10].mxu0  ;;  %v803_v25 = vpack.c.bf16 %v785_v20, %v784_v19 }
 0x145   : > { %v1180_v27 = vpop.f32.mrb[11].mxu0 }
 0x146   : > { %v736_v28 = vadd.f32 %v1178_v23, %v452_v26  ;;  %v1181_v29 = vadd.f32 %v1180_v27, %v1179_v24  ;;  %1224 = vmatprep.subr.bf16.mxu1 %v803_v25  ;;  %v502_v27 = vpop.permute.xlu0 %501 }
 0x147   : > { %1225 = vmatpush3.bf16.msra.mxu1 %v803_v25 }
 0x148   : > { %v739_v31 = vadd.f32 %v1181_v29, %v457_v30  ;;  %v786_v32 = vmax.f32 %v736_v28, 0.0 }
 0x14a   : > { %v787_v33 = vmax.f32 %v739_v31, 0.0  ;;  %v1182_v34 = vpop.f32.mrb[12].mxu0  ;;  %v507_v31 = vpop.permute.xlu1 %506 }
 0x14b   : > { %v1183_v35 = vpop.f32.mrb[13].mxu0 }
 0x14c   : > { %v1184_v36 = vadd.f32 %v1183_v35, %v1182_v34  ;;  %v1185_v37 = vpop.f32.mrb[14].mxu0  ;;  %v804_v38 = vpack.c.bf16 %v787_v33, %v786_v32 }
 0x14d   : > { %v1186_v40 = vpop.f32.mrb[15].mxu0 }
 0x14e   : > { %v744_v41 = vadd.f32 %v1184_v36, %v462_v39  ;;  %v1187_v42 = vadd.f32 %v1186_v40, %v1185_v37  ;;  %1226 = vmatprep.subr.bf16.mxu1 %v804_v38  ;;  %v1345_v36 = vld [vmem:[%s1876_s4 + $0x8] sm:$0xff]   ;;  %v817_v37 = vpop.permute.xlu0 %816 }
 0x14f   : > { %1227 = vmatpush3.bf16.msra.mxu1 %v804_v38  ;;  %v822_v38 = vpop.permute.xlu1 %821 }
 0x150   : > { %v747_v44 = vadd.f32 %v1187_v42, %v467_v43  ;;  %v788_v45 = vmax.f32 %v744_v41, 0.0 }
 0x152   : > { %v789_v46 = vmax.f32 %v747_v44, 0.0  ;;  %v1188_v47 = vpop.f32.mrb[16].mxu0  ;;  %v827_v39 = vpop.permute.xlu0 %826 }
 0x153   : > { %v1189_v48 = vpop.f32.mrb[17].mxu0  ;;  %v832_v40 = vpop.permute.xlu1 %831 }
 0x154   : > { %v1190_v49 = vadd.f32 %v1189_v48, %v1188_v47  ;;  %v1191_v50 = vpop.f32.mrb[18].mxu0  ;;  %v805_v51 = vpack.c.bf16 %v789_v46, %v788_v45 }
 0x155   : > { %v1192_v53 = vpop.f32.mrb[19].mxu0 }
 0x156   : > { %v752_v54 = vadd.f32 %v1190_v49, %v472_v52  ;;  %v1193_v55 = vadd.f32 %v1192_v53, %v1191_v50  ;;  %1228 = vmatprep.subr.bf16.mxu1 %v805_v51  ;;  %v906_v46 = vpop.permute.xlu0 %905 }
 0x157   : > { %1229 = vmatpush3.bf16.msra.mxu1 %v805_v51  ;;  %v911_v51 = vpop.permute.xlu1 %910 }
 0x158   : > { %v755_v57 = vadd.f32 %v1193_v55, %v477_v56  ;;  %v790_v58 = vmax.f32 %v752_v54, 0.0 }
 0x15a   : > { %v791_v59 = vmax.f32 %v755_v57, 0.0  ;;  %v1194_v60 = vpop.f32.mrb[20].mxu0  ;;  %v916_v57 = vpop.permute.xlu0 %915 }
 0x15b   : > { %v1195_v61 = vpop.f32.mrb[21].mxu0 }
 0x15c   : > { %v1196_v62 = vadd.f32 %v1195_v61, %v1194_v60  ;;  %v1197_v63 = vpop.f32.mrb[22].mxu0  ;;  %v806_v0 = vpack.c.bf16 %v791_v59, %v790_v58  ;;  %v921_v60 = vpop.permute.xlu1 %920 }
 0x15d   : > { %v1198_v2 = vpop.f32.mrb[23].mxu0 }
 0x15e   : > { %v760_v3 = vadd.f32 %v1196_v62, %v482_v1  ;;  %v1199_v4 = vadd.f32 %v1198_v2, %v1197_v63  ;;  %1230 = vmatprep.subr.bf16.mxu1 %v806_v0  ;;  %v942_v63 = vlaneseq }
 0x15f   : > { %1231 = vmatpush3.bf16.msra.mxu1 %v806_v0 }
 0x160   : > { %v763_v6 = vadd.f32 %v1199_v4, %v487_v5  ;;  %v792_v7 = vmax.f32 %v760_v3, 0.0  ;;  %v943_v2 = vshrl.u32 %v942_v63, 7 }
 0x162   : > { %v793_v8 = vmax.f32 %v763_v6, 0.0  ;;  %v1200_v9 = vpop.f32.mrb[24].mxu0  ;;  %v944_v5 = vsub.s32 0, %v943_v2 }
 0x163   : > { %v1201_v10 = vpop.f32.mrb[25].mxu0 }
 0x164   : > { %v1202_v11 = vadd.f32 %v1201_v10, %v1200_v9  ;;  %v1203_v12 = vpop.f32.mrb[26].mxu0  ;;  %v807_v13 = vpack.c.bf16 %v793_v8, %v792_v7  ;;  %v940_v7 = vpop.permute.xlu0 %939 }
 0x165   : > { %v1204_v15 = vpop.f32.mrb[27].mxu0  ;;  %v945_v9 = vrot.slane %v940_v7, %v944_v5 }
 0x166   : > { %v768_v16 = vadd.f32 %v1202_v11, %v492_v14  ;;  %v1205_v17 = vadd.f32 %v1204_v15, %v1203_v12  ;;  %1232 = vmatprep.subr.bf16.mxu1 %v807_v13  ;;  %v949_v11 = vand.u32 127, %v942_v63  ;;  %v954_v12 = vld [vmem:[%s363_s25] sm:$0x1] }
 0x167   : > { %1233 = vmatpush3.bf16.msra.mxu1 %v807_v13  ;;  %v956_v13 = vstv %s1903_s29 }
 0x168   : > { %v771_v19 = vadd.f32 %v1205_v17, %v497_v18  ;;  %v794_v20 = vmax.f32 %v768_v16, 0.0  ;;  %vm957_vm0 = vcmp.lt.s32.totalorder %v949_v11, %v956_v13  ;;  %v1479_v18 = vmov (!%p1141_p12), 0.0  }
 0x169   : > { %965 = vst.msk [vmem:[#allocation7] sm:$0x1] (!%p1141_p12), %vm964_vm1, %v1479_v18 }
 0x16a   : > { %v795_v21 = vmax.f32 %v771_v19, 0.0  ;;  %v1206_v22 = vpop.f32.mrb[28].mxu0 }
 0x16b   : > { %v1207_v23 = vpop.f32.mrb[29].mxu0 }
 0x16c   : > { %v1208_v24 = vadd.f32 %v1207_v23, %v1206_v22  ;;  %v1209_v25 = vpop.f32.mrb[30].mxu0  ;;  %v808_v26 = vpack.c.bf16 %v795_v21, %v794_v20 }
 0x16d   : > { %v1210_v28 = vpop.f32.mrb[31].mxu0 }
 0x16e   : > { %v776_v29 = vadd.f32 %v1208_v24, %v502_v27  ;;  %v1211_v30 = vadd.f32 %v1210_v28, %v1209_v25  ;;  %1234 = vmatprep.subr.bf16.mxu1 %v808_v26 }
 0x16f   : > { %1235 = vmatpush3.bf16.msra.mxu1 %v808_v26 }
 0x170   : > { %v779_v32 = vadd.f32 %v1211_v30, %v507_v31  ;;  %v796_v33 = vmax.f32 %v776_v29, 0.0 }
 0x172   : > { %v797_v34 = vmax.f32 %v779_v32, 0.0 }
 0x174   : > { %v809_v35 = vpack.c.bf16 %v797_v34, %v796_v33 }
 0x176   : > { %1236 = vmatprep.subr.bf16.mxu1 %v809_v35 }
 0x177   : > { %1237 = vmatpush3.bf16.msra.mxu1 %v809_v35 }
 0x17a   : > { %1239 = vmatmul.mubr.bf16.vlgmr.msra.gmra.mrb[0].mxu1 %v1345_v36 }
 0x24d   : > { %v1240_v41 = vpop.f32.mrb[0].mxu1 }
 0x24e   : > { %v880_v42 = vpop.f32.mrb[1].mxu1  ;;  %v889_v43 = vadd.f32 %v1240_v41, %v827_v39 }
 0x24f   : > { %v881_v44 = vadd.f32 %v880_v42, %v817_v37  ;;  %v1241_v45 = vpop.f32.mrb[2].mxu1 }
 0x250   : > { %v883_v47 = vpop.f32.mrb[3].mxu1  ;;  %v892_v49 = vadd.f32 %v1241_v45, %v832_v40  ;;  %v897_v52 = vmax.f32 %v889_v43, 0.0 }
 0x251   : > { %v895_v48 = vmax.f32 %v881_v44, 0.0  ;;  %v884_v50 = vadd.f32 %v883_v47, %v822_v38 }
 0x252   : > { %v898_v55 = vmax.f32 %v892_v49, 0.0  ;;  %v925_v58 = vmul.f32 %v916_v57, %v897_v52 }
 0x253   : > { %v896_v53 = vmax.f32 %v884_v50, 0.0  ;;  %v923_v54 = vmul.f32 %v906_v46, %v895_v48 }
 0x254   : > { %v926_v61 = vmul.f32 %v921_v60, %v898_v55 }
 0x255   : > { %v924_v56 = vmul.f32 %v911_v51, %v896_v53 }
 0x257   : > { %v927_v59 = vadd.f32 %v924_v56, %v923_v54 }
 0x259   : > { %v928_v62 = vadd.f32 %v927_v59, %v925_v58 }
 0x25b   : > { %v929_v0 = vadd.f32 %v928_v62, %v926_v61 }
 0x25d   : > { %v930_v1 = vrot.slane %v929_v0, 4 }
 0x25f   : > { %v931_v3 = vadd.f32 %v930_v1, %v929_v0 }
 0x261   : > { %v932_v4 = vrot.slane %v931_v3, 2 }
 0x263   : > { %v933_v6 = vadd.f32 %v932_v4, %v931_v3 }
 0x265   : > { %v934_v8 = vrot.slane %v933_v6, 1 }
 0x267   : > { %v935_v10 = vadd.f32 %v934_v8, %v933_v6 }
 0x269   : > { %v946_v14 = vadd.f32 %v945_v9, %v935_v10  ;;  %963 = sbr.rel (%p1141_p12) target bundleno = 624 (0x270), region = 60 }
 0x26b   : > { %947 = vst [vmem:[%s358_s18] sm:$0x1] %v946_v14  ;;  %v955_v15 = vsub.f32 %v946_v14, %v954_v12 }
 0x26d   : > { %v958_v16 = vmul.f32 %v955_v15, %v955_v15 }
 0x26f   : > { %v959_v17 = vsel %vm957_vm0, %v958_v16, 0.0 }
 0x270 PF: > { %vm967_vm2 = vcmask 1040384   ;;  %v966_v27 = vld [vmem:[#allocation7] sm:$0x1]  ;;  %vm980_vm3 = vcmask 0   ;;  %p1142_p13 = scmp.ne.s32.totalorder %s1556_s7, 1 }
 0x271   : > { %v968_v19 = vsel %vm967_vm2, %v959_v17, 0.0 }
 0x272   : > { %969 = vadd.xlane.f32.xlu0 %v968_v19 }
 0x2ff   : > { %v970_v20 = vpop.xlane.xlu0 %969 }
 0x300   : > { %v971_v21 = vrot.slane %v970_v20, 4 }
 0x302   : > { %v972_v22 = vadd.f32 %v971_v21, %v970_v20 }
 0x304   : > { %v973_v23 = vrot.slane %v972_v22, 2 }
 0x306   : > { %v974_v24 = vadd.f32 %v973_v23, %v972_v22 }
 0x308   : > { %v975_v25 = vrot.slane %v974_v24, 1 }
 0x30a   : > { %v976_v26 = vadd.f32 %v975_v25, %v974_v24 }
 0x30c   : > { %1242 = vpush %v976_v26 }
 0x33b   : > { %985 = sbr.rel (%p1142_p13) target bundleno = 844 (0x34c), region = 64 }
 0x33d   : > { %s1243_s26 = spop %1242 }
 0x33e   : > { %v978_v28 = vstv %s1243_s26 }
 0x33f   : > { %v979_v29 = vadd.f32 %v978_v28, %v966_v27 }
 0x341   : > { %981 = vst.msk [vmem:[#allocation7] sm:$0x1] %vm980_vm3, %v979_v29 }
 0x348   : > { %v986_v30 = vld [vmem:[#allocation7] sm:$0x1] }
 0x349   : > { %v987_v31 = vmul.f32 0.00625, %v986_v30 }
 0x34b   : > { %988 = vst.msk [vmem:[#allocation7] sm:$0x1] %vm980_vm3, %v987_v31 }
 0x34c PF: > { %s1143_s27 = sshll.u32 %s1556_s7, 4  ;;  %s1002_s20 = sshll.u32 %s358_s18, 4  ;;  %s1003_s20 = int_to_ptr.vmem [resolvable:$true] %s1002_s20 }
 0x34d   : > { %s1810_s21 = scalar_lea.hbm %s1880_s8, %s1143_s27  ;;  %s990_s29 = scalar_lea.sflag [#allocation5], %s1643_s28 }
 0x34e   : > { %s1376_s10 = scalar_lea.vmem %s1003_s20, 16  ;;  %p1890_p10 = scmp.ne.s32.totalorder %s1886_s22, 0 }
 0x34f   : > { %p1377_p4 = scmp.ne.s32.totalorder %s1003_s20, %s1376_s10  ;;  %s1480_s15 = smov [#allocation6]  }
 0x350   : > { %s1380_s17 = sshll.u32 %s1480_s15, 4  ;;  %s1381_s17 = int_to_ptr.vmem [resolvable:$false] %s1380_s17 }
 0x351   : > { %p1378_p1 = pnand %p1377_p4, %p1890_p10  ;;  %s1382_s25 = scalar_lea.vmem %s1381_s17, 32 }
 0x352   : > { %p1383_p5 = scmp.lt.s32.totalorder %s1003_s20, %s1381_s17  ;;  %p1384_p8 = scmp.lt.s32.totalorder %s1382_s25, %s1376_s10 }
 0x353   : > { %p1379_p3 = pneg %p1378_p1 }
 0x354   : > { %p1385_p9 = por %p1384_p8, %p1383_p5 }
 0x356   : > { %p1386_p7 = pnand %p1385_p9, %p1379_p3 }
 0x358   : > { %1389 = shalt.err (!%p1386_p7)
}
 0x359   : > { %s1390_s28 = scalar_lea.hbm %s1810_s21, 16  ;;  %s1394_s27 = scalar_lea.hbm %s1880_s8, 32 }
 0x35a   : > { %p1391_p0 = scmp.ne.s32.totalorder %s1810_s21, %s1390_s28  ;;  %p1395_p11 = scmp.lt.u32.totalorder %s1810_s21, %s1880_s8 }
 0x35b   : > { %p1396_p12 = scmp.lt.u32.totalorder %s1394_s27, %s1390_s28  ;;  %p1398_p4 = scmp.lt.u32.totalorder %s1390_s28, %s1810_s21 }
 0x35c   : > { %p1392_p2 = pnand %p1391_p0, %p1890_p10 }
 0x35d   : > { %p1397_p13 = por %p1396_p12, %p1395_p11 }
 0x35e   : > { %p1393_p6 = pneg %p1392_p2 }
 0x35f   : > { %p1399_p1 = por %p1398_p4, %p1397_p13 }
 0x361   : > { %p1400_p3 = pnand %p1399_p1, %p1393_p6 }
 0x363   : > { %1403 = shalt.err (!%p1400_p3)
}
 0x364   : > { %1246 = dma.vmem_to_hbm [thread:$0]  (%p1890_p10), %s1003_s20, 16, %s1810_s21, %s990_s29  }
 0x365   : > { %s1481_s10 = smov [#allocation7]   ;;  %p1891_p8 = scmp.eq.s32.totalorder %s1556_s7, 1 }
 0x366   : > { %s1013_s15 = sshll.u32 %s1481_s10, 4  ;;  %s1014_s15 = int_to_ptr.vmem [resolvable:$true] %s1013_s15 }
 0x367   : > { %s1404_s17 = scalar_lea.vmem %s1014_s15, 16  ;;  %s1410_s25 = scalar_lea.vmem %s1014_s15, 32 }
 0x368   : > { %p1405_p5 = scmp.ne.s32.totalorder %s1014_s15, %s1404_s17  ;;  %p1411_p0 = scmp.lt.s32.totalorder %s1014_s15, %s1014_s15 }
 0x369   : > { %p1412_p2 = scmp.lt.s32.totalorder %s1410_s25, %s1404_s17 }
 0x36a   : > { %p1406_p9 = pnand %p1405_p5, %p1891_p8 }
 0x36b   : > { %p1413_p11 = por %p1412_p2, %p1411_p0 }
 0x36c   : > { %p1407_p7 = pneg %p1406_p9 }
 0x36e   : > { %p1414_p12 = pnand %p1413_p11, %p1407_p7 }
 0x370   : > { %1417 = shalt.err (!%p1414_p12)
}
 0x371   : > { %s1418_s22 = scalar_lea.hbm %s1881_s9, 16  ;;  %p1892_p6 = pmov %p1891_p8 }
 0x372   : > { %p1419_p10 = scmp.ne.s32.totalorder %s1881_s9, %s1418_s22  ;;  %p1424_p1 = scmp.lt.u32.totalorder %s1418_s22, %s1881_s9 }
 0x374   : > { %p1420_p13 = pnand %p1419_p10, %p1892_p6 }
 0x376   : > { %p1421_p4 = pneg %p1420_p13 }
 0x378   : > { %p1426_p3 = pnand %p1424_p1, %p1421_p4 }
 0x37a   : > { %1429 = shalt.err (!%p1426_p3)
}
 0x37b   : > { %p1893_p5 = pmov %p1892_p6 }
 0x37d   : > { %1248 = dma.vmem_to_hbm [thread:$0]  (%p1893_p5), %s1014_s15, 16, %s1881_s9, [#allocation8]  }
 0x37e   : > { %p1894_p8 = pmov %p1893_p5 }
 0x37f   : > { %p1895_p9 = pmov %p1893_p5 }
 0x380   : > { %1451 = dma.done.wait (%p1894_p8), [#allocation8], 16  }
 0x381   : > { %1453 = vsyncadd (%p1895_p9), [#allocation8], 4294967280 }
 0x382 PF: > { %s1029_s30 = sand.u32 1, %s1460_s11   ;;  %p1896_p7 = scmp.ne.s32.totalorder %s1887_s23, 0 }
 0x383   : > { %p1897_p0 = scmp.ge.s32.totalorder %s1472_s14, 2  ;;  %s1030_s10 = scalar_lea.sflag [#allocation5], %s1029_s30 }
 0x385   : > { %p1257_p2 = pnand %p1897_p0, %p1896_p7 }
 0x387   : > { %1455 = dma.done.wait (!%p1257_p2), %s1030_s10, 16  }
 0x388   : > { %1457 = vsyncadd (!%p1257_p2), %s1030_s10, 4294967280  ;;  %p26_p11 = scmp.ge.s32.totalorder %s1560_s16, 4   ;;  %s1898_s11 = smov %s1464_s12 }
 0x389   : > { %s1899_s12 = smov %s1468_s13  ;;  %s1900_s13 = smov %s1572_s19 }
 0x38a   : > { %s1901_s14 = smov %s1560_s16  ;;  %28 = sbr.rel (!%p26_p11) target bundleno = 9 (0x9), region = 116 }
 0x391   :  { %1034 = vsyncpa [#allocation4], 1 }
 0x392   :  { %1036 = vsyncpa [#allocation4 + $0x1], 1 }
 0x393   :  { %1037 = vsyncpa [#allocation5], 1 }
 0x394   :  { %1039 = vsyncpa [#allocation5 + $0x1], 1 }
 0x395   :  { %1040 = vsyncpa [#allocation8], 1 }

</bundles_post_ra>
